<compile_context>
chip_gen: v6e
topology: v6e:2x2x1
jax: 0.10.0
libtpu: 0.0.40
codegen_flags: <defaults>
</compile_context>

<pallas_src>
import jax
import jax.numpy as jnp
from jax.experimental import pallas as pl
from jax.experimental.pallas import tpu as pltpu


def _pos_enc_kernel(x_ref, pe_ref, o_ref):
    # x_ref : (B_TILE, S, D)    tokens, already in (batch, seq, d_model) layout
    # pe_ref: (1, S+1, D)       positional encodings; row 0 already includes cls_token
    # o_ref : (B_TILE, S+1, D)
    b_tile = x_ref.shape[0]
    d_model = o_ref.shape[2]

    pe = pe_ref[0]                                       # (S+1, D)

    # cls row (= cls_token + pe[0]) broadcast over the batch tile: one store.
    cls_rows = jnp.broadcast_to(pe[0:1, :][None, :, :], (b_tile, 1, d_model))
    o_ref[:, 0:1, :] = cls_rows.astype(o_ref.dtype)

    # Token rows: one batched VPU add over the whole tile, one slice-store.
    o_ref[:, 1:, :] = (x_ref[...] + pe[1:, :][None, :, :]).astype(o_ref.dtype)


def _round_up(x, m):
    return -(-x // m) * m


def _tiling_params():
    """(block budget bytes, vmem_limit_bytes, num TensorCores) per TPU generation."""
    try:
        kind = jax.devices()[0].device_kind.lower()
    except Exception:
        kind = ""
    if "v7" in kind:    # 2 TensorCores per chip, 64 MiB *physical* VMEM per TC
        return 20 << 20, 40 << 20, 2
    if "v6" in kind:    # 1 TC, 128 MiB physical VMEM
        return 24 << 20, 48 << 20, 1
    if "v5" in kind:    # 1 TC, 128 MiB physical VMEM, smaller scoped default
        return 12 << 20, 32 << 20, 1
    return 12 << 20, 32 << 20, 1            # unknown generation: conservative


def _choose_b_tile(B, S, D, itemsize):
    """Batch tile: as large as the per-generation VMEM budget allows."""
    budget, vmem_limit, num_tc = _tiling_params()
    # VMEM-resident (padded to (8,128)) bytes per batch element per grid step,
    # x block + out block, times 2 for the pipeline's double buffering.
    x_blk = _round_up(max(S, 1), 8) * _round_up(D, 128) * itemsize
    out_blk = _round_up(S + 1, 8) * _round_up(D, 128) * itemsize
    per_batch = 2 * (x_blk + out_blk)
    b_tile = max(1, min(B, budget // per_batch))
    if num_tc > 1 and B > 1:
        # v7x: make the step count a multiple of num_tc with (near-)equal tiles
        # so neither TensorCore idles on a ragged tail.  On single-TC parts we
        # deliberately do NOT force extra grid steps (they are pure overhead).
        steps = _round_up(max(num_tc, -(-B // b_tile)), num_tc)
        b_tile = -(-B // steps)
    return b_tile, vmem_limit


def positional_encoding(x_ncl, cls_token, pe):
    """Equivalent of PositionalEncoding.forward.

    x_ncl     : (B, d_model, squeeze_seq)
    cls_token : (1, 1, d_model)
    pe        : (1, seq_len - 7, d_model)   with seq_len - 7 >= squeeze_seq + 1
    returns   : (B, squeeze_seq + 1, d_model)
    """
    B, D, S = x_ncl.shape
    assert cls_token.shape == (1, 1, D)
    assert pe.shape[0] == 1 and pe.shape[2] == D and pe.shape[1] >= S + 1

    dtype = x_ncl.dtype
    # Fold the cls token into row 0 of the (tiny, grid-invariant) pe table:
    #   out[:, 0, :]  = cls_token + pe[:, 0, :]
    #   out[:, 1:, :] = permute(x) + pe[:, 1:, :]
    # In a real model this fold would be precomputed once at init; under jit it
    # is a negligible fused op on a (S+1, D) array.
    pe_eff = pe[:, : S + 1, :].astype(dtype)
    pe_eff = pe_eff.at[:, 0:1, :].add(cls_token.astype(dtype))

    # The module's (0,2,1) permute, done by XLA so the kernel's x block is
    # lane-dense (last dim = D) with fully dense HBM<->VMEM DMAs and no
    # in-kernel XLU work.  squeeze_seq is small for this module, so the extra
    # x pass is cheap next to the (S+1)-row output traffic.
    x_bsd = jnp.transpose(x_ncl, (0, 2, 1))

    itemsize = jnp.dtype(dtype).itemsize
    b_tile, vmem_limit = _choose_b_tile(B, S, D, itemsize)
    grid = (pl.cdiv(B, b_tile),)

    cost = pl.CostEstimate(
        flops=B * (S + 1) * D,
        transcendentals=0,
        bytes_accessed=itemsize * (B * S * D + (S + 1) * D + B * (S + 1) * D),
    )

    return pl.pallas_call(
        _pos_enc_kernel,
        out_shape=jax.ShapeDtypeStruct((B, S + 1, D), dtype),
        grid_spec=pltpu.PrefetchScalarGridSpec(
            num_scalar_prefetch=0,
            grid=grid,
            in_specs=[
                pl.BlockSpec((b_tile, S, D), lambda i: (i, 0, 0)),
                # grid-invariant (constant index_map): fetched once, never re-DMA'd.
                pl.BlockSpec((1, S + 1, D), lambda i: (0, 0, 0)),
            ],
            out_specs=pl.BlockSpec((b_tile, S + 1, D), lambda i: (i, 0, 0)),
        ),
        compiler_params=pltpu.CompilerParams(
            dimension_semantics=("parallel",),
            vmem_limit_bytes=vmem_limit,
        ),
        cost_estimate=cost,
    )(x_bsd, pe_eff)


def reference(x_ncl, cls_token, pe):
    x = jnp.transpose(x_ncl, (0, 2, 1))              # (B, S, D)
    B, S, D = x.shape
    cls_b = jnp.broadcast_to(cls_token, (B, 1, D))
    cat = jnp.concatenate([cls_b, x], axis=1)
    return cat + pe[:, : S + 1, :]


if __name__ == "__main__":
    # Module-consistent small shapes:
    #   seq_len = 16  -> pe has seq_len - 7 = 9 positions
    #   squeeze_seq = 8 tokens, so squeeze_seq + 1 = 9 <= 9
    #   d_model = 128 (typical ViT width; keeps the output lane-dense)
    B, D, S = 8, 128, 8
    seq_len = 16

    key = jax.random.PRNGKey(0)
    k_x, k_cls, k_pe = jax.random.split(key, 3)

    x = jax.random.normal(k_x, (B, D, S), dtype=jnp.float32)
    cls_token = jax.random.normal(k_cls, (1, 1, D), dtype=jnp.float32)
    pe = jax.random.normal(k_pe, (1, seq_len - 7, D), dtype=jnp.float32)

    fwd = jax.jit(positional_encoding)
    out = jax.block_until_ready(fwd(x, cls_token, pe))
    ref = reference(x, cls_token, pe)

    assert out.shape == (B, S + 1, D), out.shape
    assert jnp.allclose(out, ref, atol=1e-6, rtol=1e-6), "mismatch vs reference"

    print("KERNEL_OK")
</pallas_src>

<mosaic_0001>
module attributes {stable_mosaic.version = 11 : i64} {
  func.func @_pos_enc_kernel(%arg0: i32, %arg1: memref<8x8x128xf32, #tpu.memory_space<vmem>>, %arg2: memref<1x9x128xf32, #tpu.memory_space<vmem>>, %arg3: memref<8x9x128xf32, #tpu.memory_space<vmem>>) attributes {dimension_semantics = [#tpu.dimension_semantics<parallel>], iteration_bounds = array<i64: 1>, scalar_prefetch = 0 : i64, scratch_operands = 0 : i64, tpu.core_type = #tpu.core_type<tc>, window_params = [{transform_indices = @transform_0, window_bounds = array<i64: 8, 8, 128>}, {pipeline_mode = #tpu.pipeline_mode<synchronous>, transform_indices = @transform_1, window_bounds = array<i64: 1, 9, 128>}, {transform_indices = @transform_2, window_bounds = array<i64: 8, 9, 128>}]} {
    %c0 = arith.constant 0 : index
    %c0_0 = arith.constant 0 : index
    %c0_1 = arith.constant 0 : index
    %0 = vector.load %arg2[%c0, %c0_0, %c0_1] : memref<1x9x128xf32, #tpu.memory_space<vmem>>, vector<1x9x128xf32>
    %1 = vector.shape_cast %0 : vector<1x9x128xf32> to vector<9x128xf32>
    %2 = vector.extract_strided_slice %1 {offsets = [0, 0], sizes = [1, 128], strides = [1, 1]} : vector<9x128xf32> to vector<1x128xf32>
    %3 = vector.shape_cast %2 : vector<1x128xf32> to vector<1x1x128xf32>
    %4 = vector.shape_cast %3 : vector<1x1x128xf32> to vector<1x1x128xf32>
    %5 = vector.broadcast %4 : vector<1x1x128xf32> to vector<8x1x128xf32>
    %c0_2 = arith.constant 0 : index
    %c0_3 = arith.constant 0 : index
    %c0_4 = arith.constant 0 : index
    %6 = vector.load %arg3[%c0_2, %c0_3, %c0_4] : memref<8x9x128xf32, #tpu.memory_space<vmem>>, vector<8x1x128xf32>
    tpu.vector_store %arg3[%c0_2, %c0_3, %c0_4], %5 {strides = array<i32>} : memref<8x9x128xf32, #tpu.memory_space<vmem>>, vector<8x1x128xf32>,
    %c0_5 = arith.constant 0 : index
    %c0_6 = arith.constant 0 : index
    %c0_7 = arith.constant 0 : index
    %7 = vector.load %arg1[%c0_5, %c0_6, %c0_7] : memref<8x8x128xf32, #tpu.memory_space<vmem>>, vector<8x8x128xf32>
    %8 = vector.extract_strided_slice %1 {offsets = [1, 0], sizes = [8, 128], strides = [1, 1]} : vector<9x128xf32> to vector<8x128xf32>
    %9 = vector.shape_cast %8 : vector<8x128xf32> to vector<1x8x128xf32>
    %10 = vector.broadcast %9 : vector<1x8x128xf32> to vector<8x8x128xf32>
    %11 = arith.addf %7, %10 : vector<8x8x128xf32>
    %c0_8 = arith.constant 0 : index
    %c1 = arith.constant 1 : index
    %c0_9 = arith.constant 0 : index
    %12 = vector.load %arg3[%c0_8, %c1, %c0_9] : memref<8x9x128xf32, #tpu.memory_space<vmem>>, vector<8x8x128xf32>
    tpu.vector_store %arg3[%c0_8, %c1, %c0_9], %11 {strides = array<i32>} : memref<8x9x128xf32, #tpu.memory_space<vmem>>, vector<8x8x128xf32>,
    return
  }
  func.func @transform_0(%arg0: i32) -> (i32, i32, i32) {
    %c0_i32 = arith.constant 0 : i32
    %c0_i32_0 = arith.constant 0 : i32
    %c0_i32_1 = arith.constant 0 : i32
    return %arg0, %c0_i32, %c0_i32_0 : i32, i32, i32
  }
  func.func @transform_1(%arg0: i32) -> (i32, i32, i32) {
    %c0_i32 = arith.constant 0 : i32
    %c0_i32_0 = arith.constant 0 : i32
    %c0_i32_1 = arith.constant 0 : i32
    %c0_i32_2 = arith.constant 0 : i32
    return %c0_i32, %c0_i32_0, %c0_i32_1 : i32, i32, i32
  }
  func.func @transform_2(%arg0: i32) -> (i32, i32, i32) {
    %c0_i32 = arith.constant 0 : i32
    %c0_i32_0 = arith.constant 0 : i32
    %c0_i32_1 = arith.constant 0 : i32
    return %arg0, %c0_i32, %c0_i32_0 : i32, i32, i32
  }
}

</mosaic_0001>

<bundles_post_ra>
// kernel: positional_encoding.1
= control target key start
LH: loop header
LB: loop body
LE: loop exit
PB: predicated region body
PF: predicated region fallthrough
CT: control target
= control target key end

     0   :  { %7 = vsyncpa [#allocation3], 0  ;;  %s96_s9 = smov [#allocation2]   ;;  %s172_s0 = inlined_call_operand.hbm [shape: f32[8,8,128], index: 0, kind: input, shape index: {}]   ;;  %s173_s1 = inlined_call_operand.vmem [shape: f32[1,9,128], index: 1, kind: input, shape index: {}]   ;;  %s174_s2 = inlined_call_operand.vmem [shape: f32[8,9,128], index: 2, kind: output, shape index: {}]  }
   0x1   :  { %s13_s10 = sshll.u32 %s96_s9, 4  ;;  %s14_s10 = int_to_ptr.vmem [resolvable:$true] %s13_s10 }
   0x2   :  { %s82_s11 = scalar_lea.vmem %s14_s10, 1024  ;;  %p87_p1 = scmp.lt.s32.totalorder %s14_s10, %s14_s10 }
   0x3   :  { %p83_p0 = scmp.ne.s32.totalorder %s14_s10, %s82_s11  ;;  %p88_p2 = scmp.lt.s32.totalorder %s82_s11, %s82_s11 }
   0x5   :  { %p89_p3 = por %p88_p2, %p87_p1 }
   0x7   :  { %p90_p4 = pnand %p89_p3, %p83_p0 }
   0x9   :  { %93 = shalt.err (!%p90_p4)
}
   0xa   :  { %s97_s12 = smov 128   ;;  %s98_s13 = smov 8  }
   0xb   :  { %19 = dma.hbm_to_vmem [thread:$0]  %s172_s0, 1024, %s14_s10, [#allocation3], %s97_s12, %s97_s12, %s98_s13  }
   0xc   :  { %94 = dma.done.wait [#allocation3], 1024  }
   0xd   :  { %95 = vsyncadd [#allocation3], 4294966272  ;;  %v25_v0 = vld [vmem:[%s173_s1] sm:$0xff]  ;;  %v26_v1 = vld [vmem:[%s173_s1 + $0x8] sm:$0x1]  ;;  %vm45_vm0 = vcmask 1046528  }
   0xe   :  { %v35_v2 = vld [vmem:[#allocation2] sm:$0xff]  ;;  %27 = vst [vmem:[%s174_s2] sm:$0x1] %v25_v0  ;;  %28 = vst [vmem:[%s174_s2 + $0x10] sm:$0x1] %v25_v0  ;;  %v46_v3 = vrot.slane %v25_v0, 1  ;;  %v47_v4 = vrot.slane %v26_v1, 1 }
   0xf   :  { %29 = vst [vmem:[%s174_s2 + $0x20] sm:$0x1] %v25_v0  ;;  %30 = vst [vmem:[%s174_s2 + $0x30] sm:$0x1] %v25_v0  ;;  %v36_v5 = vld [vmem:[#allocation2 + $0x8] sm:$0xff]  ;;  %v37_v6 = vld [vmem:[#allocation2 + $0x10] sm:$0xff] }
  0x10   :  { %31 = vst [vmem:[%s174_s2 + $0x40] sm:$0x1] %v25_v0  ;;  %32 = vst [vmem:[%s174_s2 + $0x50] sm:$0x1] %v25_v0  ;;  %v38_v7 = vld [vmem:[#allocation2 + $0x18] sm:$0xff]  ;;  %v39_v8 = vld [vmem:[#allocation2 + $0x20] sm:$0xff]  ;;  %v48_v11 = vsel %vm45_vm0, %v46_v3, %v47_v4 }
  0x11   :  { %33 = vst [vmem:[%s174_s2 + $0x60] sm:$0x1] %v25_v0  ;;  %34 = vst [vmem:[%s174_s2 + $0x70] sm:$0x1] %v25_v0  ;;  %v40_v9 = vld [vmem:[#allocation2 + $0x28] sm:$0xff]  ;;  %v41_v10 = vld [vmem:[#allocation2 + $0x30] sm:$0xff]  ;;  %v50_v13 = vadd.f32 %v48_v11, %v35_v2  ;;  %v51_v14 = vadd.f32 %v48_v11, %v36_v5  ;;  %v52_v15 = vadd.f32 %v48_v11, %v37_v6 }
  0x12   :  { %v42_v12 = vld [vmem:[#allocation2 + $0x38] sm:$0xff]  ;;  %v53_v16 = vadd.f32 %v48_v11, %v38_v7  ;;  %v54_v17 = vadd.f32 %v48_v11, %v39_v8  ;;  %v55_v18 = vadd.f32 %v48_v11, %v40_v9  ;;  %v56_v19 = vadd.f32 %v48_v11, %v41_v10 }
  0x13   :  { %v57_v20 = vadd.f32 %v48_v11, %v42_v12  ;;  %58 = vst [vmem:[%s174_s2 + $0x1] sm:$0xff] %v50_v13  ;;  %59 = vst [vmem:[%s174_s2 + $0x11] sm:$0xff] %v51_v14 }
  0x14   :  { %60 = vst [vmem:[%s174_s2 + $0x21] sm:$0xff] %v52_v15  ;;  %61 = vst [vmem:[%s174_s2 + $0x31] sm:$0xff] %v53_v16 }
  0x15   :  { %62 = vst [vmem:[%s174_s2 + $0x41] sm:$0xff] %v54_v17  ;;  %63 = vst [vmem:[%s174_s2 + $0x51] sm:$0xff] %v55_v18 }
  0x16   :  { %64 = vst [vmem:[%s174_s2 + $0x61] sm:$0xff] %v56_v19  ;;  %65 = vst [vmem:[%s174_s2 + $0x71] sm:$0xff] %v57_v20 }
  0x17   :  { %70 = vsyncpa [#allocation3], 1 }

</bundles_post_ra>
